<compile_context>
chip_gen: v6e
topology: v6e:2x2x1
jax: 0.10.0
libtpu: 0.0.40
codegen_flags: <defaults>
</compile_context>

<pallas_src>
import jax
import jax.numpy as jnp
from jax import lax
from jax.experimental import pallas as pl
from jax.experimental.pallas import tpu as pltpu


def _round_up(x: int, m: int) -> int:
    return (x + m - 1) // m * m


def _mapping_kernel_resident(deep: int, eps: float, d_real: int, compute_dtype, unroll: bool):
    """All layer weights/biases resident in VMEM; layer loop inside the kernel."""

    def kernel(z_ref, w_ref, b_ref, out_ref, act_ref):
        # Pixel-norm over the *real* feature count (padded lanes are zero).
        z = z_ref[...].astype(jnp.float32)
        ssq = jnp.sum(z * z, axis=-1, keepdims=True)
        act_ref[...] = z * lax.rsqrt(ssq * (1.0 / d_real) + eps)

        def body(l, carry):
            # (tb, Dp) @ (Dp, Dp) on the MXU, f32 accumulation.
            y = jnp.dot(act_ref[...].astype(compute_dtype), w_ref[l],
                        preferred_element_type=jnp.float32) + b_ref[l]
            act_ref[...] = jnp.maximum(y, 0.2 * y)          # LeakyReLU(0.2)
            return carry

        lax.fori_loop(0, deep, body, 0, unroll=unroll)
        out_ref[...] = act_ref[...].astype(out_ref.dtype)

    return kernel


def _mapping_kernel_streamed(deep: int, eps: float, d_real: int, compute_dtype):
    """Weights stay in HBM; per-layer slabs are streamed with a manual double-buffer."""

    def kernel(z_ref, w_hbm, b_ref, out_ref, act_ref, wbuf, sem):
        z = z_ref[...].astype(jnp.float32)
        ssq = jnp.sum(z * z, axis=-1, keepdims=True)
        act_ref[...] = z * lax.rsqrt(ssq * (1.0 / d_real) + eps)

        # Prime layer 0's weight DMA.
        pltpu.make_async_copy(w_hbm.at[0], wbuf.at[0], sem.at[0]).start()

        def body(l, carry):
            slot = lax.rem(l, 2)
            # Wait for this layer's weights.
            pltpu.make_async_copy(w_hbm.at[l], wbuf.at[slot], sem.at[slot]).wait()

            # Prefetch next layer's weights into the other slot (overlaps the matmul).
            @pl.when(l + 1 < deep)
            def _():
                pltpu.make_async_copy(w_hbm.at[l + 1], wbuf.at[1 - slot],
                                      sem.at[1 - slot]).start()

            y = jnp.dot(act_ref[...].astype(compute_dtype), wbuf[slot],
                        preferred_element_type=jnp.float32) + b_ref[l]
            act_ref[...] = jnp.maximum(y, 0.2 * y)
            return carry

        lax.fori_loop(0, deep, body, 0, unroll=False)
        out_ref[...] = act_ref[...].astype(out_ref.dtype)

    return kernel


def mapping_forward(z, weights, biases, eps=1e-8, block_b=256, weights_dtype=None):
    """z: (B, D); weights: (deep, D, D) in (in, out) orientation; biases: (deep, D).

    block_b: batch tile (rows per MXU pass). 256 fills a v6e/v7x MXU; use 128 on v5e.
    weights_dtype: None -> auto (bf16 for padded D >= 256, else f32).
    """
    B, D = z.shape
    deep = weights.shape[0]
    assert weights.shape == (deep, D, D) and biases.shape == (deep, D)

    # ---- Lane-dense feature dim + fixed batch tiling with padded ragged tail ----
    Dp = _round_up(D, 128)                  # full 128-lane vregs, unmasked stores
    tb = min(block_b, _round_up(B, 8))      # sublane-aligned batch tile
    Bp = _round_up(B, tb)
    grid_b = Bp // tb

    if weights_dtype is None:
        weights_dtype = jnp.bfloat16 if Dp >= 256 else jnp.float32
    itemsize = jnp.dtype(weights_dtype).itemsize

    zp = jnp.pad(z, ((0, Bp - B), (0, Dp - D)))
    wp = jnp.pad(weights.astype(weights_dtype), ((0, 0), (0, Dp - D), (0, Dp - D)))
    bp = jnp.pad(biases.astype(jnp.float32), ((0, 0), (0, Dp - D))).reshape(deep, 1, Dp)

    # ---- VMEM budgeting (re-derived against v7x's 64 MiB/TC) ----
    w_bytes = deep * Dp * Dp * itemsize
    b_bytes = deep * Dp * 4
    tile_bytes = tb * Dp * 4
    unroll = Dp <= 256

    flops = 2 * Bp * Dp * Dp * deep
    bytes_accessed = Bp * Dp * 4 * 2 + w_bytes + deep * Dp * 4
    cost = pl.CostEstimate(flops=flops, transcendentals=Bp,
                           bytes_accessed=bytes_accessed)
    common_params = dict(dimension_semantics=("parallel",))

    # Resident-weight path only when the (double-buffered) weight block fits easily
    # inside v7x's 64 MiB/TC alongside the pipelined activation tiles.
    resident = w_bytes <= 12 * 1024 * 1024

    if resident:
        vmem_limit = int(min(60 * 1024 * 1024,
                             max(32 * 1024 * 1024,
                                 2 * (w_bytes + b_bytes) + 5 * tile_bytes + (2 << 20))))
        out_p = pl.pallas_call(
            _mapping_kernel_resident(deep, eps, D, weights_dtype, unroll),
            out_shape=jax.ShapeDtypeStruct((Bp, Dp), z.dtype),
            grid_spec=pltpu.PrefetchScalarGridSpec(
                num_scalar_prefetch=0,
                grid=(grid_b,),
                in_specs=[
                    pl.BlockSpec((tb, Dp), lambda i: (i, 0)),           # batch tile
                    pl.BlockSpec((deep, Dp, Dp), lambda i: (0, 0, 0)),  # all weights, resident
                    pl.BlockSpec((deep, 1, Dp), lambda i: (0, 0, 0)),   # all biases, resident
                ],
                out_specs=pl.BlockSpec((tb, Dp), lambda i: (i, 0)),
                scratch_shapes=[pltpu.VMEM((tb, Dp), jnp.float32)],     # activation carry
            ),
            compiler_params=pltpu.CompilerParams(vmem_limit_bytes=vmem_limit,
                                                 **common_params),
            cost_estimate=cost,
        )(zp, wp, bp)
    else:
        # Weights too large to hold resident (v7x 64 MiB/TC): stream per-layer slabs.
        vmem_limit = int(min(60 * 1024 * 1024,
                             max(32 * 1024 * 1024,
                                 2 * Dp * Dp * itemsize + 2 * b_bytes
                                 + 5 * tile_bytes + (2 << 20))))
        out_p = pl.pallas_call(
            _mapping_kernel_streamed(deep, eps, D, weights_dtype),
            out_shape=jax.ShapeDtypeStruct((Bp, Dp), z.dtype),
            grid_spec=pltpu.PrefetchScalarGridSpec(
                num_scalar_prefetch=0,
                grid=(grid_b,),
                in_specs=[
                    pl.BlockSpec((tb, Dp), lambda i: (i, 0)),           # batch tile
                    pl.BlockSpec(memory_space=pl.ANY),                  # weights stay in HBM
                    pl.BlockSpec((deep, 1, Dp), lambda i: (0, 0, 0)),   # biases (tiny), resident
                ],
                out_specs=pl.BlockSpec((tb, Dp), lambda i: (i, 0)),
                scratch_shapes=[
                    pltpu.VMEM((tb, Dp), jnp.float32),                  # activation carry
                    pltpu.VMEM((2, Dp, Dp), weights_dtype),             # layer-weight double-buffer
                    pltpu.SemaphoreType.DMA((2,)),
                ],
            ),
            compiler_params=pltpu.CompilerParams(vmem_limit_bytes=vmem_limit,
                                                 **common_params),
            cost_estimate=cost,
        )(zp, wp, bp)

    return out_p[:B, :D]


def mapping_reference(z, weights, biases, eps=1e-8):
    """Plain-JAX reference mirroring the PyTorch forward."""
    z = z * lax.rsqrt(jnp.mean(z * z, axis=-1, keepdims=True) + eps)
    for l in range(weights.shape[0]):
        z = z @ weights[l] + biases[l]
        z = jnp.where(z >= 0, z, 0.2 * z)
    return z


if __name__ == "__main__":
    # Small, module-consistent shapes: batch=8, z_dim=32, deep_mapping=8.
    B, D, DEEP = 8, 32, 8
    eps = 1e-8

    key = jax.random.PRNGKey(0)
    kz, kw = jax.random.split(key)

    z = jax.random.normal(kz, (B, D), dtype=jnp.float32)

    # Deterministic param init matching nn.init.xavier_normal_ (std = sqrt(2/(fan_in+fan_out)))
    # and zero biases. Weights stored as (deep, in, out).
    xavier_std = (2.0 / (D + D)) ** 0.5
    weights = jax.random.normal(kw, (DEEP, D, D), dtype=jnp.float32) * xavier_std
    biases = jnp.zeros((DEEP, D), dtype=jnp.float32)

    out = mapping_forward(z, weights, biases, eps=eps)
    out = jax.block_until_ready(out)

    ref = mapping_reference(z, weights, biases, eps=eps)
    assert out.shape == (B, D)
    assert jnp.allclose(out, ref, atol=1e-5, rtol=1e-5), "mismatch vs reference"

    print("KERNEL_OK")
</pallas_src>

<mosaic_0001>
module attributes {stable_mosaic.version = 11 : i64} {
  func.func @kernel(%arg0: i32, %arg1: memref<8x128xf32, #tpu.memory_space<vmem>>, %arg2: memref<8x128x128xf32, #tpu.memory_space<vmem>>, %arg3: memref<8x1x128xf32, #tpu.memory_space<vmem>>, %arg4: memref<8x128xf32, #tpu.memory_space<vmem>>, %arg5: memref<8x128xf32, #tpu.memory_space<vmem>>) attributes {dimension_semantics = [#tpu.dimension_semantics<parallel>], iteration_bounds = array<i64: 1>, scalar_prefetch = 0 : i64, scratch_operands = 1 : i64, tpu.core_type = #tpu.core_type<tc>, window_params = [{transform_indices = @transform_0, window_bounds = array<i64: 8, 128>}, {pipeline_mode = #tpu.pipeline_mode<synchronous>, transform_indices = @transform_1, window_bounds = array<i64: 8, 128, 128>}, {pipeline_mode = #tpu.pipeline_mode<synchronous>, transform_indices = @transform_2, window_bounds = array<i64: 8, 1, 128>}, {transform_indices = @transform_3, window_bounds = array<i64: 8, 128>}]} {
    %c0 = arith.constant 0 : index
    %c0_0 = arith.constant 0 : index
    %0 = vector.load %arg1[%c0, %c0_0] : memref<8x128xf32, #tpu.memory_space<vmem>>, vector<8x128xf32>
    %1 = arith.mulf %0, %0 : vector<8x128xf32>
    %cst = arith.constant dense<0.000000e+00> : vector<8xf32>
    %2 = vector.multi_reduction <add>, %1, %cst [1] : vector<8x128xf32> to vector<8xf32>
    %3 = vector.shape_cast %2 : vector<8xf32> to vector<8x1xf32>
    %cst_1 = arith.constant 3.125000e-02 : f32
    %4 = vector.broadcast %cst_1 : f32 to vector<8x1xf32>
    %5 = arith.mulf %3, %4 : vector<8x1xf32>
    %cst_2 = arith.constant 9.99999993E-9 : f32
    %6 = vector.broadcast %cst_2 : f32 to vector<8x1xf32>
    %7 = arith.addf %5, %6 : vector<8x1xf32>
    %8 = math.rsqrt %7 : vector<8x1xf32>
    %9 = vector.broadcast %8 : vector<8x1xf32> to vector<8x128xf32>
    %10 = arith.mulf %0, %9 : vector<8x128xf32>
    %c0_3 = arith.constant 0 : index
    %c0_4 = arith.constant 0 : index
    %11 = vector.load %arg5[%c0_3, %c0_4] : memref<8x128xf32, #tpu.memory_space<vmem>>, vector<8x128xf32>
    tpu.vector_store %arg5[%c0_3, %c0_4], %10 {strides = array<i32>} : memref<8x128xf32, #tpu.memory_space<vmem>>, vector<8x128xf32>,
    %c0_i32 = arith.constant 0 : i32
    %c0_5 = arith.constant 0 : index
    %c0_6 = arith.constant 0 : index
    %12 = vector.load %arg5[%c0_5, %c0_6] : memref<8x128xf32, #tpu.memory_space<vmem>>, vector<8x128xf32>
    %13 = arith.index_cast %c0_i32 : i32 to index
    %c0_7 = arith.constant 0 : index
    %c0_8 = arith.constant 0 : index
    %14 = vector.load %arg2[%13, %c0_7, %c0_8] : memref<8x128x128xf32, #tpu.memory_space<vmem>>, vector<1x128x128xf32>
    %15 = vector.shape_cast %14 : vector<1x128x128xf32> to vector<128x128xf32>
    %cst_9 = arith.constant dense<0.000000e+00> : vector<8x128xf32>
    %16 = tpu.matmul %12, %15, %cst_9 {dimension_numbers = #tpu.dot_dimension_numbers<[1], [0], [0], [1], [0, 0, 1, 1], [], []>} : vector<8x128xf32>, vector<128x128xf32>, vector<8x128xf32> -> vector<8x128xf32>
    %17 = arith.index_cast %c0_i32 : i32 to index
    %c0_10 = arith.constant 0 : index
    %c0_11 = arith.constant 0 : index
    %18 = vector.load %arg3[%17, %c0_10, %c0_11] : memref<8x1x128xf32, #tpu.memory_space<vmem>>, vector<1x1x128xf32>
    %19 = vector.shape_cast %18 : vector<1x1x128xf32> to vector<1x128xf32>
    %20 = vector.broadcast %19 : vector<1x128xf32> to vector<8x128xf32>
    %21 = arith.addf %16, %20 : vector<8x128xf32>
    %cst_12 = arith.constant 2.000000e-01 : f32
    %22 = vector.broadcast %cst_12 : f32 to vector<8x128xf32>
    %23 = arith.mulf %22, %21 : vector<8x128xf32>
    %24 = arith.maximumf %21, %23 : vector<8x128xf32>
    %c0_13 = arith.constant 0 : index
    %c0_14 = arith.constant 0 : index
    %25 = vector.load %arg5[%c0_13, %c0_14] : memref<8x128xf32, #tpu.memory_space<vmem>>, vector<8x128xf32>
    tpu.vector_store %arg5[%c0_13, %c0_14], %24 {strides = array<i32>} : memref<8x128xf32, #tpu.memory_space<vmem>>, vector<8x128xf32>,
    %c1_i32 = arith.constant 1 : i32
    %c0_15 = arith.constant 0 : index
    %c0_16 = arith.constant 0 : index
    %26 = vector.load %arg5[%c0_15, %c0_16] : memref<8x128xf32, #tpu.memory_space<vmem>>, vector<8x128xf32>
    %27 = arith.index_cast %c1_i32 : i32 to index
    %c0_17 = arith.constant 0 : index
    %c0_18 = arith.constant 0 : index
    %28 = vector.load %arg2[%27, %c0_17, %c0_18] : memref<8x128x128xf32, #tpu.memory_space<vmem>>, vector<1x128x128xf32>
    %29 = vector.shape_cast %28 : vector<1x128x128xf32> to vector<128x128xf32>
    %cst_19 = arith.constant dense<0.000000e+00> : vector<8x128xf32>
    %30 = tpu.matmul %26, %29, %cst_19 {dimension_numbers = #tpu.dot_dimension_numbers<[1], [0], [0], [1], [0, 0, 1, 1], [], []>} : vector<8x128xf32>, vector<128x128xf32>, vector<8x128xf32> -> vector<8x128xf32>
    %31 = arith.index_cast %c1_i32 : i32 to index
    %c0_20 = arith.constant 0 : index
    %c0_21 = arith.constant 0 : index
    %32 = vector.load %arg3[%31, %c0_20, %c0_21] : memref<8x1x128xf32, #tpu.memory_space<vmem>>, vector<1x1x128xf32>
    %33 = vector.shape_cast %32 : vector<1x1x128xf32> to vector<1x128xf32>
    %34 = vector.broadcast %33 : vector<1x128xf32> to vector<8x128xf32>
    %35 = arith.addf %30, %34 : vector<8x128xf32>
    %cst_22 = arith.constant 2.000000e-01 : f32
    %36 = vector.broadcast %cst_22 : f32 to vector<8x128xf32>
    %37 = arith.mulf %36, %35 : vector<8x128xf32>
    %38 = arith.maximumf %35, %37 : vector<8x128xf32>
    %c0_23 = arith.constant 0 : index
    %c0_24 = arith.constant 0 : index
    %39 = vector.load %arg5[%c0_23, %c0_24] : memref<8x128xf32, #tpu.memory_space<vmem>>, vector<8x128xf32>
    tpu.vector_store %arg5[%c0_23, %c0_24], %38 {strides = array<i32>} : memref<8x128xf32, #tpu.memory_space<vmem>>, vector<8x128xf32>,
    %c2_i32 = arith.constant 2 : i32
    %c0_25 = arith.constant 0 : index
    %c0_26 = arith.constant 0 : index
    %40 = vector.load %arg5[%c0_25, %c0_26] : memref<8x128xf32, #tpu.memory_space<vmem>>, vector<8x128xf32>
    %41 = arith.index_cast %c2_i32 : i32 to index
    %c0_27 = arith.constant 0 : index
    %c0_28 = arith.constant 0 : index
    %42 = vector.load %arg2[%41, %c0_27, %c0_28] : memref<8x128x128xf32, #tpu.memory_space<vmem>>, vector<1x128x128xf32>
    %43 = vector.shape_cast %42 : vector<1x128x128xf32> to vector<128x128xf32>
    %cst_29 = arith.constant dense<0.000000e+00> : vector<8x128xf32>
    %44 = tpu.matmul %40, %43, %cst_29 {dimension_numbers = #tpu.dot_dimension_numbers<[1], [0], [0], [1], [0, 0, 1, 1], [], []>} : vector<8x128xf32>, vector<128x128xf32>, vector<8x128xf32> -> vector<8x128xf32>
    %45 = arith.index_cast %c2_i32 : i32 to index
    %c0_30 = arith.constant 0 : index
    %c0_31 = arith.constant 0 : index
    %46 = vector.load %arg3[%45, %c0_30, %c0_31] : memref<8x1x128xf32, #tpu.memory_space<vmem>>, vector<1x1x128xf32>
    %47 = vector.shape_cast %46 : vector<1x1x128xf32> to vector<1x128xf32>
    %48 = vector.broadcast %47 : vector<1x128xf32> to vector<8x128xf32>
    %49 = arith.addf %44, %48 : vector<8x128xf32>
    %cst_32 = arith.constant 2.000000e-01 : f32
    %50 = vector.broadcast %cst_32 : f32 to vector<8x128xf32>
    %51 = arith.mulf %50, %49 : vector<8x128xf32>
    %52 = arith.maximumf %49, %51 : vector<8x128xf32>
    %c0_33 = arith.constant 0 : index
    %c0_34 = arith.constant 0 : index
    %53 = vector.load %arg5[%c0_33, %c0_34] : memref<8x128xf32, #tpu.memory_space<vmem>>, vector<8x128xf32>
    tpu.vector_store %arg5[%c0_33, %c0_34], %52 {strides = array<i32>} : memref<8x128xf32, #tpu.memory_space<vmem>>, vector<8x128xf32>,
    %c3_i32 = arith.constant 3 : i32
    %c0_35 = arith.constant 0 : index
    %c0_36 = arith.constant 0 : index
    %54 = vector.load %arg5[%c0_35, %c0_36] : memref<8x128xf32, #tpu.memory_space<vmem>>, vector<8x128xf32>
    %55 = arith.index_cast %c3_i32 : i32 to index
    %c0_37 = arith.constant 0 : index
    %c0_38 = arith.constant 0 : index
    %56 = vector.load %arg2[%55, %c0_37, %c0_38] : memref<8x128x128xf32, #tpu.memory_space<vmem>>, vector<1x128x128xf32>
    %57 = vector.shape_cast %56 : vector<1x128x128xf32> to vector<128x128xf32>
    %cst_39 = arith.constant dense<0.000000e+00> : vector<8x128xf32>
    %58 = tpu.matmul %54, %57, %cst_39 {dimension_numbers = #tpu.dot_dimension_numbers<[1], [0], [0], [1], [0, 0, 1, 1], [], []>} : vector<8x128xf32>, vector<128x128xf32>, vector<8x128xf32> -> vector<8x128xf32>
    %59 = arith.index_cast %c3_i32 : i32 to index
    %c0_40 = arith.constant 0 : index
    %c0_41 = arith.constant 0 : index
    %60 = vector.load %arg3[%59, %c0_40, %c0_41] : memref<8x1x128xf32, #tpu.memory_space<vmem>>, vector<1x1x128xf32>
    %61 = vector.shape_cast %60 : vector<1x1x128xf32> to vector<1x128xf32>
    %62 = vector.broadcast %61 : vector<1x128xf32> to vector<8x128xf32>
    %63 = arith.addf %58, %62 : vector<8x128xf32>
    %cst_42 = arith.constant 2.000000e-01 : f32
    %64 = vector.broadcast %cst_42 : f32 to vector<8x128xf32>
    %65 = arith.mulf %64, %63 : vector<8x128xf32>
    %66 = arith.maximumf %63, %65 : vector<8x128xf32>
    %c0_43 = arith.constant 0 : index
    %c0_44 = arith.constant 0 : index
    %67 = vector.load %arg5[%c0_43, %c0_44] : memref<8x128xf32, #tpu.memory_space<vmem>>, vector<8x128xf32>
    tpu.vector_store %arg5[%c0_43, %c0_44], %66 {strides = array<i32>} : memref<8x128xf32, #tpu.memory_space<vmem>>, vector<8x128xf32>,
    %c4_i32 = arith.constant 4 : i32
    %c0_45 = arith.constant 0 : index
    %c0_46 = arith.constant 0 : index
    %68 = vector.load %arg5[%c0_45, %c0_46] : memref<8x128xf32, #tpu.memory_space<vmem>>, vector<8x128xf32>
    %69 = arith.index_cast %c4_i32 : i32 to index
    %c0_47 = arith.constant 0 : index
    %c0_48 = arith.constant 0 : index
    %70 = vector.load %arg2[%69, %c0_47, %c0_48] : memref<8x128x128xf32, #tpu.memory_space<vmem>>, vector<1x128x128xf32>
    %71 = vector.shape_cast %70 : vector<1x128x128xf32> to vector<128x128xf32>
    %cst_49 = arith.constant dense<0.000000e+00> : vector<8x128xf32>
    %72 = tpu.matmul %68, %71, %cst_49 {dimension_numbers = #tpu.dot_dimension_numbers<[1], [0], [0], [1], [0, 0, 1, 1], [], []>} : vector<8x128xf32>, vector<128x128xf32>, vector<8x128xf32> -> vector<8x128xf32>
    %73 = arith.index_cast %c4_i32 : i32 to index
    %c0_50 = arith.constant 0 : index
    %c0_51 = arith.constant 0 : index
    %74 = vector.load %arg3[%73, %c0_50, %c0_51] : memref<8x1x128xf32, #tpu.memory_space<vmem>>, vector<1x1x128xf32>
    %75 = vector.shape_cast %74 : vector<1x1x128xf32> to vector<1x128xf32>
    %76 = vector.broadcast %75 : vector<1x128xf32> to vector<8x128xf32>
    %77 = arith.addf %72, %76 : vector<8x128xf32>
    %cst_52 = arith.constant 2.000000e-01 : f32
    %78 = vector.broadcast %cst_52 : f32 to vector<8x128xf32>
    %79 = arith.mulf %78, %77 : vector<8x128xf32>
    %80 = arith.maximumf %77, %79 : vector<8x128xf32>
    %c0_53 = arith.constant 0 : index
    %c0_54 = arith.constant 0 : index
    %81 = vector.load %arg5[%c0_53, %c0_54] : memref<8x128xf32, #tpu.memory_space<vmem>>, vector<8x128xf32>
    tpu.vector_store %arg5[%c0_53, %c0_54], %80 {strides = array<i32>} : memref<8x128xf32, #tpu.memory_space<vmem>>, vector<8x128xf32>,
    %c5_i32 = arith.constant 5 : i32
    %c0_55 = arith.constant 0 : index
    %c0_56 = arith.constant 0 : index
    %82 = vector.load %arg5[%c0_55, %c0_56] : memref<8x128xf32, #tpu.memory_space<vmem>>, vector<8x128xf32>
    %83 = arith.index_cast %c5_i32 : i32 to index
    %c0_57 = arith.constant 0 : index
    %c0_58 = arith.constant 0 : index
    %84 = vector.load %arg2[%83, %c0_57, %c0_58] : memref<8x128x128xf32, #tpu.memory_space<vmem>>, vector<1x128x128xf32>
    %85 = vector.shape_cast %84 : vector<1x128x128xf32> to vector<128x128xf32>
    %cst_59 = arith.constant dense<0.000000e+00> : vector<8x128xf32>
    %86 = tpu.matmul %82, %85, %cst_59 {dimension_numbers = #tpu.dot_dimension_numbers<[1], [0], [0], [1], [0, 0, 1, 1], [], []>} : vector<8x128xf32>, vector<128x128xf32>, vector<8x128xf32> -> vector<8x128xf32>
    %87 = arith.index_cast %c5_i32 : i32 to index
    %c0_60 = arith.constant 0 : index
    %c0_61 = arith.constant 0 : index
    %88 = vector.load %arg3[%87, %c0_60, %c0_61] : memref<8x1x128xf32, #tpu.memory_space<vmem>>, vector<1x1x128xf32>
    %89 = vector.shape_cast %88 : vector<1x1x128xf32> to vector<1x128xf32>
    %90 = vector.broadcast %89 : vector<1x128xf32> to vector<8x128xf32>
    %91 = arith.addf %86, %90 : vector<8x128xf32>
    %cst_62 = arith.constant 2.000000e-01 : f32
    %92 = vector.broadcast %cst_62 : f32 to vector<8x128xf32>
    %93 = arith.mulf %92, %91 : vector<8x128xf32>
    %94 = arith.maximumf %91, %93 : vector<8x128xf32>
    %c0_63 = arith.constant 0 : index
    %c0_64 = arith.constant 0 : index
    %95 = vector.load %arg5[%c0_63, %c0_64] : memref<8x128xf32, #tpu.memory_space<vmem>>, vector<8x128xf32>
    tpu.vector_store %arg5[%c0_63, %c0_64], %94 {strides = array<i32>} : memref<8x128xf32, #tpu.memory_space<vmem>>, vector<8x128xf32>,
    %c6_i32 = arith.constant 6 : i32
    %c0_65 = arith.constant 0 : index
    %c0_66 = arith.constant 0 : index
    %96 = vector.load %arg5[%c0_65, %c0_66] : memref<8x128xf32, #tpu.memory_space<vmem>>, vector<8x128xf32>
    %97 = arith.index_cast %c6_i32 : i32 to index
    %c0_67 = arith.constant 0 : index
    %c0_68 = arith.constant 0 : index
    %98 = vector.load %arg2[%97, %c0_67, %c0_68] : memref<8x128x128xf32, #tpu.memory_space<vmem>>, vector<1x128x128xf32>
    %99 = vector.shape_cast %98 : vector<1x128x128xf32> to vector<128x128xf32>
    %cst_69 = arith.constant dense<0.000000e+00> : vector<8x128xf32>
    %100 = tpu.matmul %96, %99, %cst_69 {dimension_numbers = #tpu.dot_dimension_numbers<[1], [0], [0], [1], [0, 0, 1, 1], [], []>} : vector<8x128xf32>, vector<128x128xf32>, vector<8x128xf32> -> vector<8x128xf32>
    %101 = arith.index_cast %c6_i32 : i32 to index
    %c0_70 = arith.constant 0 : index
    %c0_71 = arith.constant 0 : index
    %102 = vector.load %arg3[%101, %c0_70, %c0_71] : memref<8x1x128xf32, #tpu.memory_space<vmem>>, vector<1x1x128xf32>
    %103 = vector.shape_cast %102 : vector<1x1x128xf32> to vector<1x128xf32>
    %104 = vector.broadcast %103 : vector<1x128xf32> to vector<8x128xf32>
    %105 = arith.addf %100, %104 : vector<8x128xf32>
    %cst_72 = arith.constant 2.000000e-01 : f32
    %106 = vector.broadcast %cst_72 : f32 to vector<8x128xf32>
    %107 = arith.mulf %106, %105 : vector<8x128xf32>
    %108 = arith.maximumf %105, %107 : vector<8x128xf32>
    %c0_73 = arith.constant 0 : index
    %c0_74 = arith.constant 0 : index
    %109 = vector.load %arg5[%c0_73, %c0_74] : memref<8x128xf32, #tpu.memory_space<vmem>>, vector<8x128xf32>
    tpu.vector_store %arg5[%c0_73, %c0_74], %108 {strides = array<i32>} : memref<8x128xf32, #tpu.memory_space<vmem>>, vector<8x128xf32>,
    %c7_i32 = arith.constant 7 : i32
    %c0_75 = arith.constant 0 : index
    %c0_76 = arith.constant 0 : index
    %110 = vector.load %arg5[%c0_75, %c0_76] : memref<8x128xf32, #tpu.memory_space<vmem>>, vector<8x128xf32>
    %111 = arith.index_cast %c7_i32 : i32 to index
    %c0_77 = arith.constant 0 : index
    %c0_78 = arith.constant 0 : index
    %112 = vector.load %arg2[%111, %c0_77, %c0_78] : memref<8x128x128xf32, #tpu.memory_space<vmem>>, vector<1x128x128xf32>
    %113 = vector.shape_cast %112 : vector<1x128x128xf32> to vector<128x128xf32>
    %cst_79 = arith.constant dense<0.000000e+00> : vector<8x128xf32>
    %114 = tpu.matmul %110, %113, %cst_79 {dimension_numbers = #tpu.dot_dimension_numbers<[1], [0], [0], [1], [0, 0, 1, 1], [], []>} : vector<8x128xf32>, vector<128x128xf32>, vector<8x128xf32> -> vector<8x128xf32>
    %115 = arith.index_cast %c7_i32 : i32 to index
    %c0_80 = arith.constant 0 : index
    %c0_81 = arith.constant 0 : index
    %116 = vector.load %arg3[%115, %c0_80, %c0_81] : memref<8x1x128xf32, #tpu.memory_space<vmem>>, vector<1x1x128xf32>
    %117 = vector.shape_cast %116 : vector<1x1x128xf32> to vector<1x128xf32>
    %118 = vector.broadcast %117 : vector<1x128xf32> to vector<8x128xf32>
    %119 = arith.addf %114, %118 : vector<8x128xf32>
    %cst_82 = arith.constant 2.000000e-01 : f32
    %120 = vector.broadcast %cst_82 : f32 to vector<8x128xf32>
    %121 = arith.mulf %120, %119 : vector<8x128xf32>
    %122 = arith.maximumf %119, %121 : vector<8x128xf32>
    %c0_83 = arith.constant 0 : index
    %c0_84 = arith.constant 0 : index
    %123 = vector.load %arg5[%c0_83, %c0_84] : memref<8x128xf32, #tpu.memory_space<vmem>>, vector<8x128xf32>
    tpu.vector_store %arg5[%c0_83, %c0_84], %122 {strides = array<i32>} : memref<8x128xf32, #tpu.memory_space<vmem>>, vector<8x128xf32>,
    %c8_i32 = arith.constant 8 : i32
    %c0_85 = arith.constant 0 : index
    %c0_86 = arith.constant 0 : index
    %124 = vector.load %arg5[%c0_85, %c0_86] : memref<8x128xf32, #tpu.memory_space<vmem>>, vector<8x128xf32>
    %c0_87 = arith.constant 0 : index
    %c0_88 = arith.constant 0 : index
    %125 = vector.load %arg4[%c0_87, %c0_88] : memref<8x128xf32, #tpu.memory_space<vmem>>, vector<8x128xf32>
    tpu.vector_store %arg4[%c0_87, %c0_88], %124 {strides = array<i32>} : memref<8x128xf32, #tpu.memory_space<vmem>>, vector<8x128xf32>,
    return
  }
  func.func @transform_0(%arg0: i32) -> (i32, i32) {
    %c0_i32 = arith.constant 0 : i32
    %c0_i32_0 = arith.constant 0 : i32
    return %arg0, %c0_i32 : i32, i32
  }
  func.func @transform_1(%arg0: i32) -> (i32, i32, i32) {
    %c0_i32 = arith.constant 0 : i32
    %c0_i32_0 = arith.constant 0 : i32
    %c0_i32_1 = arith.constant 0 : i32
    %c0_i32_2 = arith.constant 0 : i32
    return %c0_i32, %c0_i32_0, %c0_i32_1 : i32, i32, i32
  }
  func.func @transform_2(%arg0: i32) -> (i32, i32, i32) {
    %c0_i32 = arith.constant 0 : i32
    %c0_i32_0 = arith.constant 0 : i32
    %c0_i32_1 = arith.constant 0 : i32
    %c0_i32_2 = arith.constant 0 : i32
    return %c0_i32, %c0_i32_0, %c0_i32_1 : i32, i32, i32
  }
  func.func @transform_3(%arg0: i32) -> (i32, i32) {
    %c0_i32 = arith.constant 0 : i32
    %c0_i32_0 = arith.constant 0 : i32
    return %arg0, %c0_i32 : i32, i32
  }
}

</mosaic_0001>

<bundles_post_ra>
// kernel: tpu_custom_call.1
= control target key start
LH: loop header
LB: loop body
LE: loop exit
PB: predicated region body
PF: predicated region fallthrough
CT: control target
= control target key end

     0   :  { %8 = vsyncpa [#allocation4], 0  ;;  %s1584_s0 = inlined_call_operand.hbm [shape: f32[8,128], index: 0, kind: input, shape index: {}]   ;;  %s1585_s1 = inlined_call_operand.hbm [shape: f32[8,128,128], index: 1, kind: input, shape index: {}]   ;;  %s1586_s2 = inlined_call_operand.hbm [shape: f32[8,1,128], index: 2, kind: input, shape index: {}]   ;;  %s1587_s3 = inlined_call_operand.hbm [shape: f32[8,128], index: 3, kind: output, shape index: {}]  }
   0x1   :  { %9 = vsyncpa [#allocation7], 0 }
   0x2   :  { %10 = vsyncpa [#allocation5], 0  ;;  %s1393_s12 = smov [#allocation6]  }
   0x3   :  { %s26_s13 = sshll.u32 %s1393_s12, 4  ;;  %s27_s13 = int_to_ptr.vmem [resolvable:$true] %s26_s13 }
   0x4   :  { %s1315_s14 = scalar_lea.vmem %s27_s13, 16384  ;;  %p1320_p1 = scmp.lt.s32.totalorder %s27_s13, %s27_s13 }
   0x5   :  { %p1316_p0 = scmp.ne.s32.totalorder %s27_s13, %s1315_s14  ;;  %p1321_p2 = scmp.lt.s32.totalorder %s1315_s14, %s1315_s14 }
   0x7   :  { %p1322_p3 = por %p1321_p2, %p1320_p1 }
   0x9   :  { %p1323_p4 = pnand %p1322_p3, %p1316_p0 }
   0xb   :  { %1326 = shalt.err (!%p1323_p4)
}
   0xc   :  { %s1394_s15 = smov 128   ;;  %s1395_s16 = smov 8  }
   0xd   :  { %32 = dma.hbm_to_vmem [thread:$0]  %s1585_s1, 16384, %s27_s13, [#allocation7], %s1394_s15, %s1394_s15, %s1395_s16  }
   0xe   :  { %s1396_s19 = smov [#allocation3]   ;;  %s1397_s21 = smov [#allocation8]  }
   0xf   :  { %s17_s20 = sshll.u32 %s1396_s19, 4  ;;  %s38_s22 = sshll.u32 %s1397_s21, 4  ;;  %s18_s20 = int_to_ptr.vmem [resolvable:$true] %s17_s20  ;;  %s39_s22 = int_to_ptr.vmem [resolvable:$true] %s38_s22 }
  0x10   :  { %s1335_s23 = scalar_lea.vmem %s18_s20, 128  ;;  %p1340_p6 = scmp.lt.s32.totalorder %s18_s20, %s18_s20 }
  0x11   :  { %p1336_p5 = scmp.ne.s32.totalorder %s18_s20, %s1335_s23  ;;  %p1341_p7 = scmp.lt.s32.totalorder %s1335_s23, %s1335_s23 }
  0x13   :  { %p1342_p8 = por %p1341_p7, %p1340_p6 }
  0x15   :  { %p1343_p9 = pnand %p1342_p8, %p1336_p5 }
  0x17   :  { %1346 = shalt.err (!%p1343_p9)
}
  0x18   :  { %20 = dma.hbm_to_vmem [thread:$0]  %s1584_s0, 128, %s18_s20, [#allocation4]  }
  0x19   :  { %s1355_s26 = scalar_lea.vmem %s39_s22, 128  ;;  %p1360_p11 = scmp.lt.s32.totalorder %s39_s22, %s39_s22 }
  0x1a   :  { %p1356_p10 = scmp.ne.s32.totalorder %s39_s22, %s1355_s26  ;;  %p1361_p12 = scmp.lt.s32.totalorder %s1355_s26, %s1355_s26 }
  0x1c   :  { %p1362_p13 = por %p1361_p12, %p1360_p11 }
  0x1e   :  { %p1363_p0 = pnand %p1362_p13, %p1356_p10 }
  0x20   :  { %1366 = shalt.err (!%p1363_p0)
}
  0x21   :  { %s1398_s1 = smov 16   ;;  %s1399_s27 = smov 1  }
  0x22   :  { %44 = dma.hbm_to_vmem [thread:$0]  %s1586_s2, 128, %s39_s22, [#allocation7], %s1398_s1, %s1398_s1, %s1399_s27  }
  0x23   :  { %1387 = dma.done.wait [#allocation4], 128  }
  0x24   :  { %1388 = vsyncadd [#allocation4], 4294967168 }
  0x25   :  { %1389 = dma.done.wait [#allocation7], 16512  }
  0x26   :  { %1390 = vsyncadd [#allocation7], 4294950784  ;;  %v1400_v0 = vmov 0.0   ;;  %v1434_v1 = vld [vmem:[#allocation3] sm:$0xff]  ;;  %v78_v3 = vld [vmem:[#allocation6 + $0x70] sm:$0xff]  ;;  %vm1401_vm0 = vmmov 0  }
  0x27   :  { %1015 = vmatprep.subr.mxu0 %v1400_v0  ;;  %1050 = vmatprep.subr.mxu1 %v1400_v0  ;;  %v79_v2 = vld [vmem:[#allocation6 + $0x78] sm:$0xff]  ;;  %v55_v4 = vmul.f32 %v1434_v1, %v1434_v1  ;;  %v77_v5 = vld [vmem:[#allocation6 + $0x68] sm:$0xff]  ;;  %v76_v6 = vld [vmem:[#allocation6 + $0x60] sm:$0xff]  ;;  %s1402_s0 = smov [#allocation9]  }
  0x28   :  { %1016 = vmatpush3.msra.mxu0 %v79_v2  ;;  %v75_v7 = vld [vmem:[#allocation6 + $0x58] sm:$0xff]  ;;  %v74_v8 = vld [vmem:[#allocation6 + $0x50] sm:$0xff]  ;;  %v73_v9 = vld [vmem:[#allocation6 + $0x48] sm:$0xff]  ;;  %1047 = vmatprep.mubr.msk.f32.mxu0 %vm1401_vm0, %v1400_v0  ;;  %s861_s2 = sshll.u32 %s1402_s0, 4  ;;  %s862_s2 = int_to_ptr.vmem [resolvable:$true] %s861_s2 }
  0x29   :  { %1017 = vmatprep.subr.mxu0 %v1400_v0  ;;  %56 = vadd.xlane.f32.xlu0 %v55_v4  ;;  %v72_v10 = vld [vmem:[#allocation6 + $0x40] sm:$0xff]  ;;  %v71_v11 = vld [vmem:[#allocation6 + $0x38] sm:$0xff]  ;;  %v70_v12 = vld [vmem:[#allocation6 + $0x30] sm:$0xff]  ;;  %s1367_s30 = scalar_lea.vmem %s862_s2, 128  ;;  %p1372_p2 = scmp.lt.s32.totalorder %s862_s2, %s862_s2 }
  0x2a   :  { %1018 = vmatpush3.msra.mxu0 %v78_v3  ;;  %v69_v13 = vld [vmem:[#allocation6 + $0x28] sm:$0xff]  ;;  %1082 = vmatprep.mubr.msk.f32.mxu1 %vm1401_vm0, %v1400_v0  ;;  %v68_v14 = vld [vmem:[#allocation6 + $0x20] sm:$0xff]  ;;  %v67_v15 = vld [vmem:[#allocation6 + $0x18] sm:$0xff]  ;;  %p1368_p1 = scmp.ne.s32.totalorder %s862_s2, %s1367_s30  ;;  %p1373_p3 = scmp.lt.s32.totalorder %s1367_s30, %s1367_s30 }
  0x2b   :  { %1019 = vmatprep.subr.mxu0 %v1400_v0  ;;  %v66_v16 = vld [vmem:[#allocation6 + $0x10] sm:$0xff]  ;;  %v65_v17 = vld [vmem:[#allocation6 + $0x8] sm:$0xff]  ;;  %v64_v18 = vld [vmem:[#allocation6] sm:$0xff] }
  0x2c   :  { %1020 = vmatpush3.msra.mxu0 %v77_v5  ;;  %v177_v19 = vld [vmem:[#allocation6 + $0xf8] sm:$0xff]  ;;  %v176_v20 = vld [vmem:[#allocation6 + $0xf0] sm:$0xff]  ;;  %v175_v21 = vld [vmem:[#allocation6 + $0xe8] sm:$0xff]  ;;  %p1374_p4 = por %p1373_p3, %p1372_p2 }
  0x2d   :  { %1021 = vmatprep.subr.mxu0 %v1400_v0  ;;  %1051 = vmatpush3.msra.mxu1 %v177_v19  ;;  %v174_v22 = vld [vmem:[#allocation6 + $0xe0] sm:$0xff]  ;;  %v173_v23 = vld [vmem:[#allocation6 + $0xd8] sm:$0xff]  ;;  %v172_v24 = vld [vmem:[#allocation6 + $0xd0] sm:$0xff] }
  0x2e   :  { %1022 = vmatpush3.msra.mxu0 %v76_v6  ;;  %1052 = vmatprep.subr.mxu1 %v1400_v0  ;;  %v171_v25 = vld [vmem:[#allocation6 + $0xc8] sm:$0xff]  ;;  %v170_v26 = vld [vmem:[#allocation6 + $0xc0] sm:$0xff]  ;;  %v169_v27 = vld [vmem:[#allocation6 + $0xb8] sm:$0xff]  ;;  %p1375_p5 = pnand %p1374_p4, %p1368_p1 }
  0x2f   :  { %1023 = vmatprep.subr.mxu0 %v1400_v0  ;;  %1053 = vmatpush3.msra.mxu1 %v176_v20  ;;  %v168_v28 = vld [vmem:[#allocation6 + $0xb0] sm:$0xff]  ;;  %v167_v29 = vld [vmem:[#allocation6 + $0xa8] sm:$0xff]  ;;  %v166_v30 = vld [vmem:[#allocation6 + $0xa0] sm:$0xff] }
  0x30   :  { %1024 = vmatpush3.msra.mxu0 %v75_v7  ;;  %1054 = vmatprep.subr.mxu1 %v1400_v0  ;;  %v165_v36 = vld [vmem:[#allocation6 + $0x98] sm:$0xff]  ;;  %v164_v37 = vld [vmem:[#allocation6 + $0x90] sm:$0xff]  ;;  %v163_v38 = vld [vmem:[#allocation6 + $0x88] sm:$0xff] }
  0x31   :  { %1025 = vmatprep.subr.mxu0 %v1400_v0  ;;  %1055 = vmatpush3.msra.mxu1 %v175_v21  ;;  %v162_v39 = vld [vmem:[#allocation6 + $0x80] sm:$0xff]  ;;  %v276_v40 = vld [vmem:[#allocation6 + $0x178] sm:$0xff]  ;;  %v275_v41 = vld [vmem:[#allocation6 + $0x170] sm:$0xff] }
  0x32   :  { %1026 = vmatpush3.msra.mxu0 %v74_v8  ;;  %1056 = vmatprep.subr.mxu1 %v1400_v0  ;;  %v274_v42 = vld [vmem:[#allocation6 + $0x168] sm:$0xff]  ;;  %v273_v43 = vld [vmem:[#allocation6 + $0x160] sm:$0xff]  ;;  %v272_v44 = vld [vmem:[#allocation6 + $0x158] sm:$0xff] }
  0x33   :  { %1027 = vmatprep.subr.mxu0 %v1400_v0  ;;  %1057 = vmatpush3.msra.mxu1 %v174_v22  ;;  %v271_v45 = vld [vmem:[#allocation6 + $0x150] sm:$0xff]  ;;  %v270_v46 = vld [vmem:[#allocation6 + $0x148] sm:$0xff]  ;;  %v269_v47 = vld [vmem:[#allocation6 + $0x140] sm:$0xff] }
  0x34   :  { %1028 = vmatpush3.msra.mxu0 %v73_v9  ;;  %1058 = vmatprep.subr.mxu1 %v1400_v0  ;;  %v268_v48 = vld [vmem:[#allocation6 + $0x138] sm:$0xff]  ;;  %v267_v49 = vld [vmem:[#allocation6 + $0x130] sm:$0xff]  ;;  %v266_v50 = vld [vmem:[#allocation6 + $0x128] sm:$0xff] }
  0x35   :  { %1029 = vmatprep.subr.mxu0 %v1400_v0  ;;  %1059 = vmatpush3.msra.mxu1 %v173_v23  ;;  %v265_v51 = vld [vmem:[#allocation6 + $0x120] sm:$0xff]  ;;  %v264_v58 = vld [vmem:[#allocation6 + $0x118] sm:$0xff]  ;;  %v263_v59 = vld [vmem:[#allocation6 + $0x110] sm:$0xff] }
  0x36   :  { %1030 = vmatpush3.msra.mxu0 %v72_v10  ;;  %1060 = vmatprep.subr.mxu1 %v1400_v0  ;;  %v871_v52 = vld [vmem:[#allocation8] ss:$0 sm:$0xff]  ;;  %v262_v60 = vld [vmem:[#allocation6 + $0x108] sm:$0xff]  ;;  %v375_v62 = vld [vmem:[#allocation6 + $0x1f8] sm:$0xff] }
  0x37   :  { %1031 = vmatprep.subr.mxu0 %v1400_v0  ;;  %1061 = vmatpush3.msra.mxu1 %v172_v24  ;;  %v261_v61 = vld [vmem:[#allocation6 + $0x100] sm:$0xff]  ;;  %v374_v63 = vld [vmem:[#allocation6 + $0x1f0] sm:$0xff]  ;;  %v371_v3 = vld [vmem:[#allocation6 + $0x1d8] sm:$0xff] }
  0x38   :  { %1032 = vmatpush3.msra.mxu0 %v71_v11  ;;  %1062 = vmatprep.subr.mxu1 %v1400_v0  ;;  %v372_v2 = vld [vmem:[#allocation6 + $0x1e0] sm:$0xff]  ;;  %v370_v4 = vld [vmem:[#allocation6 + $0x1d0] sm:$0xff]  ;;  %v369_v5 = vld [vmem:[#allocation6 + $0x1c8] sm:$0xff] }
  0x39   :  { %1033 = vmatprep.subr.mxu0 %v1400_v0  ;;  %1063 = vmatpush3.msra.mxu1 %v171_v25  ;;  %v368_v6 = vld [vmem:[#allocation6 + $0x1c0] sm:$0xff]  ;;  %v367_v7 = vld [vmem:[#allocation6 + $0x1b8] sm:$0xff]  ;;  %v366_v8 = vld [vmem:[#allocation6 + $0x1b0] sm:$0xff] }
  0x3a   :  { %1034 = vmatpush3.msra.mxu0 %v70_v12  ;;  %1064 = vmatprep.subr.mxu1 %v1400_v0  ;;  %v365_v9 = vld [vmem:[#allocation6 + $0x1a8] sm:$0xff]  ;;  %v364_v10 = vld [vmem:[#allocation6 + $0x1a0] sm:$0xff]  ;;  %v474_v21 = vld [vmem:[#allocation6 + $0x278] sm:$0xff] }
  0x3b   :  { %1035 = vmatprep.subr.mxu0 %v1400_v0  ;;  %1065 = vmatpush3.msra.mxu1 %v170_v26  ;;  %v872_v11 = vld [vmem:[#allocation8 + $0x1] ss:$0 sm:$0xff]  ;;  %v361_v19 = vld [vmem:[#allocation6 + $0x188] sm:$0xff]  ;;  %v473_v22 = vld [vmem:[#allocation6 + $0x270] sm:$0xff] }
  0x3c   :  { %1036 = vmatpush3.msra.mxu0 %v69_v13  ;;  %1066 = vmatprep.subr.mxu1 %v1400_v0  ;;  %v360_v20 = vld [vmem:[#allocation6 + $0x180] sm:$0xff]  ;;  %v472_v23 = vld [vmem:[#allocation6 + $0x268] sm:$0xff]  ;;  %v470_v25 = vld [vmem:[#allocation6 + $0x258] sm:$0xff] }
  0x3d   :  { %1037 = vmatprep.subr.mxu0 %v1400_v0  ;;  %1067 = vmatpush3.msra.mxu1 %v169_v27  ;;  %v471_v24 = vld [vmem:[#allocation6 + $0x260] sm:$0xff]  ;;  %v469_v26 = vld [vmem:[#allocation6 + $0x250] sm:$0xff]  ;;  %v468_v27 = vld [vmem:[#allocation6 + $0x248] sm:$0xff] }
  0x3e   :  { %1038 = vmatpush3.msra.mxu0 %v68_v14  ;;  %1068 = vmatprep.subr.mxu1 %v1400_v0 }
  0x3f   :  { %1039 = vmatprep.subr.mxu0 %v1400_v0  ;;  %1069 = vmatpush3.msra.mxu1 %v168_v28  ;;  %v467_v28 = vld [vmem:[#allocation6 + $0x240] sm:$0xff] }
  0x40   :  { %1040 = vmatpush3.msra.mxu0 %v67_v15  ;;  %1070 = vmatprep.subr.mxu1 %v1400_v0 }
  0x41   :  { %1041 = vmatprep.subr.mxu0 %v1400_v0  ;;  %1071 = vmatpush3.msra.mxu1 %v167_v29  ;;  %v466_v29 = vld [vmem:[#allocation6 + $0x238] sm:$0xff] }
  0x42   :  { %1042 = vmatpush3.msra.mxu0 %v66_v16  ;;  %1072 = vmatprep.subr.mxu1 %v1400_v0 }
  0x43   :  { %1043 = vmatprep.subr.mxu0 %v1400_v0  ;;  %1073 = vmatpush3.msra.mxu1 %v166_v30  ;;  %v465_v30 = vld [vmem:[#allocation6 + $0x230] sm:$0xff] }
  0x44   :  { %1044 = vmatpush3.msra.mxu0 %v65_v17  ;;  %1074 = vmatprep.subr.mxu1 %v1400_v0  ;;  %v363_v17 = vld [vmem:[#allocation6 + $0x198] sm:$0xff] }
  0x45   :  { %1045 = vmatprep.subr.mxu0 %v1400_v0  ;;  %1075 = vmatpush3.msra.mxu1 %v165_v36 }
  0x46   :  { %1046 = vmatpush3.msra.mxu0 %v64_v18  ;;  %1076 = vmatprep.subr.mxu1 %v1400_v0  ;;  %v362_v18 = vld [vmem:[#allocation6 + $0x190] sm:$0xff] }
  0x47   :  { %1085 = vmatprep.subr.mxu0 %v1400_v0  ;;  %1077 = vmatpush3.msra.mxu1 %v164_v37 }
  0x48   :  { %1078 = vmatprep.subr.mxu1 %v1400_v0 }
  0x49   :  { %1079 = vmatpush3.msra.mxu1 %v163_v38 }
  0x4a   :  { %1080 = vmatprep.subr.mxu1 %v1400_v0 }
  0x4b   :  { %1081 = vmatpush3.msra.mxu1 %v162_v39  ;;  %v462_v39 = vld [vmem:[#allocation6 + $0x218] sm:$0xff] }
  0x4c   :  { %1120 = vmatprep.subr.mxu1 %v1400_v0 }
  0xb2   :  { %v57_v31 = vpop.xlane.xlu0 %56 }
  0xb3   :  { %v58_v32 = vmul.f32 0.03125, %v57_v31  ;;  %v464_v31 = vld [vmem:[#allocation6 + $0x228] sm:$0xff] }
  0xb5   :  { %v59_v33 = vadd.f32 1e-08, %v58_v32  ;;  %v463_v32 = vld [vmem:[#allocation6 + $0x220] sm:$0xff] }
  0xb7   :  { %1305 = vrsqrt.f32 %v59_v33  ;;  %v873_v33 = vld [vmem:[#allocation8 + $0x2] ss:$0 sm:$0xff] }
  0xc4   :  { %v1306_v34 = vpop.eup %1305 }
  0xc5   :  { %v61_v35 = vmul.f32 %v1306_v34, %v1434_v1  ;;  %v373_v1 = vld [vmem:[#allocation6 + $0x1e8] sm:$0xff] }
  0xc7   :  { %1048 = vmatmul.mubr.f32.vlgmr.msra.gmra.mxu0 %v61_v35 }
  0xc8   :  { %1117 = vmatprep.mubr.msk.f32.mxu0 %vm1401_vm0, %v1400_v0  ;;  %1086 = vmatpush3.msra.mxu0 %v276_v40  ;;  %v461_v40 = vld [vmem:[#allocation6 + $0x210] sm:$0xff] }
  0xc9   :  { %1087 = vmatprep.subr.mxu0 %v1400_v0 }
  0xca   :  { %1088 = vmatpush3.msra.mxu0 %v275_v41  ;;  %v460_v41 = vld [vmem:[#allocation6 + $0x208] sm:$0xff] }
  0xcb   :  { %1089 = vmatprep.subr.mxu0 %v1400_v0 }
  0xcc   :  { %1090 = vmatpush3.msra.mxu0 %v274_v42  ;;  %v459_v42 = vld [vmem:[#allocation6 + $0x200] sm:$0xff] }
  0xcd   :  { %1091 = vmatprep.subr.mxu0 %v1400_v0 }
  0xce   :  { %1092 = vmatpush3.msra.mxu0 %v273_v43  ;;  %v573_v43 = vld [vmem:[#allocation6 + $0x2f8] sm:$0xff] }
  0xcf   :  { %1093 = vmatprep.subr.mxu0 %v1400_v0 }
  0xd0   :  { %1094 = vmatpush3.msra.mxu0 %v272_v44  ;;  %v572_v44 = vld [vmem:[#allocation6 + $0x2f0] sm:$0xff] }
  0xd1   :  { %1095 = vmatprep.subr.mxu0 %v1400_v0 }
  0xd2   :  { %1096 = vmatpush3.msra.mxu0 %v271_v45  ;;  %v571_v45 = vld [vmem:[#allocation6 + $0x2e8] sm:$0xff] }
  0xd3   :  { %1097 = vmatprep.subr.mxu0 %v1400_v0 }
  0xd4   :  { %1098 = vmatpush3.msra.mxu0 %v270_v46  ;;  %v570_v46 = vld [vmem:[#allocation6 + $0x2e0] sm:$0xff] }
  0xd5   :  { %1099 = vmatprep.subr.mxu0 %v1400_v0 }
  0xd6   :  { %1100 = vmatpush3.msra.mxu0 %v269_v47  ;;  %v569_v47 = vld [vmem:[#allocation6 + $0x2d8] sm:$0xff] }
  0xd7   :  { %1101 = vmatprep.subr.mxu0 %v1400_v0 }
  0xd8   :  { %1102 = vmatpush3.msra.mxu0 %v268_v48  ;;  %v568_v48 = vld [vmem:[#allocation6 + $0x2d0] sm:$0xff] }
  0xd9   :  { %1103 = vmatprep.subr.mxu0 %v1400_v0 }
  0xda   :  { %1104 = vmatpush3.msra.mxu0 %v267_v49  ;;  %v567_v49 = vld [vmem:[#allocation6 + $0x2c8] sm:$0xff] }
  0xdb   :  { %1105 = vmatprep.subr.mxu0 %v1400_v0 }
  0xdc   :  { %1106 = vmatpush3.msra.mxu0 %v266_v50  ;;  %v566_v50 = vld [vmem:[#allocation6 + $0x2c0] sm:$0xff] }
  0xdd   :  { %1107 = vmatprep.subr.mxu0 %v1400_v0 }
  0xde   :  { %1108 = vmatpush3.msra.mxu0 %v265_v51  ;;  %v565_v51 = vld [vmem:[#allocation6 + $0x2b8] sm:$0xff] }
  0xdf   :  { %1109 = vmatprep.subr.mxu0 %v1400_v0 }
  0xe0   :  { %1110 = vmatpush3.msra.mxu0 %v264_v58 }
  0xe1   :  { %1111 = vmatprep.subr.mxu0 %v1400_v0 }
  0xe2   :  { %1112 = vmatpush3.msra.mxu0 %v263_v59 }
  0xe3   :  { %1113 = vmatprep.subr.mxu0 %v1400_v0 }
  0xe4   :  { %1114 = vmatpush3.msra.mxu0 %v262_v60 }
  0xe5   :  { %1115 = vmatprep.subr.mxu0 %v1400_v0 }
  0xe6   :  { %1116 = vmatpush3.msra.mxu0 %v261_v61  ;;  %v561_v61 = vld [vmem:[#allocation6 + $0x298] sm:$0xff] }
  0xe7   :  { %1155 = vmatprep.subr.mxu0 %v1400_v0 }
 0x187   :  { %v153_v53 = vpop.f32.mrf.mxu0 }
 0x188   :  { %v154_v54 = vadd.f32 %v871_v52, %v153_v53  ;;  %v564_v52 = vld [vmem:[#allocation6 + $0x2b0] sm:$0xff]  ;;  %v563_v53 = vld [vmem:[#allocation6 + $0x2a8] sm:$0xff] }
 0x189   :  { %v1049_v55 = vpop.f32.mrf.mxu0 }
 0x18a   :  { %v157_v56 = vmul.f32 0.2, %v154_v54  ;;  %v874_v55 = vld [vmem:[#allocation8 + $0x3] ss:$0 sm:$0xff] }
 0x18c   :  { %v158_v57 = vmax.f32 %v154_v54, %v157_v56  ;;  %v562_v54 = vld [vmem:[#allocation6 + $0x2a0] sm:$0xff] }
 0x18e   :  { %1083 = vmatmul.mubr.f32.vlgmr.msra.gmra.mxu1 %v158_v57 }
 0x18f   :  { %1152 = vmatprep.mubr.msk.f32.mxu1 %vm1401_vm0, %v1400_v0  ;;  %1121 = vmatpush3.msra.mxu1 %v375_v62  ;;  %v560_v62 = vld [vmem:[#allocation6 + $0x290] sm:$0xff] }
 0x190   :  { %1122 = vmatprep.subr.mxu1 %v1400_v0 }
 0x191   :  { %1123 = vmatpush3.msra.mxu1 %v374_v63  ;;  %v559_v63 = vld [vmem:[#allocation6 + $0x288] sm:$0xff] }
 0x192   :  { %1124 = vmatprep.subr.mxu1 %v1400_v0 }
 0x193   :  { %1125 = vmatpush3.msra.mxu1 %v373_v1  ;;  %v558_v1 = vld [vmem:[#allocation6 + $0x280] sm:$0xff] }
 0x194   :  { %1126 = vmatprep.subr.mxu1 %v1400_v0 }
 0x195   :  { %1127 = vmatpush3.msra.mxu1 %v372_v2  ;;  %v672_v2 = vld [vmem:[#allocation6 + $0x378] sm:$0xff] }
 0x196   :  { %1128 = vmatprep.subr.mxu1 %v1400_v0 }
 0x197   :  { %1129 = vmatpush3.msra.mxu1 %v371_v3  ;;  %v671_v3 = vld [vmem:[#allocation6 + $0x370] sm:$0xff] }
 0x198   :  { %1130 = vmatprep.subr.mxu1 %v1400_v0 }
 0x199   :  { %1131 = vmatpush3.msra.mxu1 %v370_v4  ;;  %v670_v4 = vld [vmem:[#allocation6 + $0x368] sm:$0xff] }
 0x19a   :  { %1132 = vmatprep.subr.mxu1 %v1400_v0 }
 0x19b   :  { %1133 = vmatpush3.msra.mxu1 %v369_v5  ;;  %v669_v5 = vld [vmem:[#allocation6 + $0x360] sm:$0xff] }
 0x19c   :  { %1134 = vmatprep.subr.mxu1 %v1400_v0 }
 0x19d   :  { %1135 = vmatpush3.msra.mxu1 %v368_v6  ;;  %v668_v6 = vld [vmem:[#allocation6 + $0x358] sm:$0xff] }
 0x19e   :  { %1136 = vmatprep.subr.mxu1 %v1400_v0 }
 0x19f   :  { %1137 = vmatpush3.msra.mxu1 %v367_v7  ;;  %v667_v7 = vld [vmem:[#allocation6 + $0x350] sm:$0xff] }
 0x1a0   :  { %1138 = vmatprep.subr.mxu1 %v1400_v0 }
 0x1a1   :  { %1139 = vmatpush3.msra.mxu1 %v366_v8  ;;  %v666_v8 = vld [vmem:[#allocation6 + $0x348] sm:$0xff] }
 0x1a2   :  { %1140 = vmatprep.subr.mxu1 %v1400_v0 }
 0x1a3   :  { %1141 = vmatpush3.msra.mxu1 %v365_v9  ;;  %v665_v9 = vld [vmem:[#allocation6 + $0x340] sm:$0xff] }
 0x1a4   :  { %1142 = vmatprep.subr.mxu1 %v1400_v0 }
 0x1a5   :  { %1143 = vmatpush3.msra.mxu1 %v364_v10  ;;  %v664_v10 = vld [vmem:[#allocation6 + $0x338] sm:$0xff] }
 0x1a6   :  { %1144 = vmatprep.subr.mxu1 %v1400_v0 }
 0x1a7   :  { %1145 = vmatpush3.msra.mxu1 %v363_v17 }
 0x1a8   :  { %1146 = vmatprep.subr.mxu1 %v1400_v0 }
 0x1a9   :  { %1147 = vmatpush3.msra.mxu1 %v362_v18 }
 0x1aa   :  { %1148 = vmatprep.subr.mxu1 %v1400_v0 }
 0x1ab   :  { %1149 = vmatpush3.msra.mxu1 %v361_v19 }
 0x1ac   :  { %1150 = vmatprep.subr.mxu1 %v1400_v0 }
 0x1ad   :  { %1151 = vmatpush3.msra.mxu1 %v360_v20  ;;  %v660_v20 = vld [vmem:[#allocation6 + $0x318] sm:$0xff] }
 0x1ae   :  { %1190 = vmatprep.subr.mxu1 %v1400_v0 }
 0x24e   :  { %v252_v12 = vpop.f32.mrf.mxu1 }
 0x24f   :  { %v253_v13 = vadd.f32 %v872_v11, %v252_v12  ;;  %v663_v11 = vld [vmem:[#allocation6 + $0x330] sm:$0xff]  ;;  %v662_v12 = vld [vmem:[#allocation6 + $0x328] sm:$0xff] }
 0x250   :  { %v1084_v14 = vpop.f32.mrf.mxu1 }
 0x251   :  { %v256_v15 = vmul.f32 0.2, %v253_v13  ;;  %v875_v14 = vld [vmem:[#allocation8 + $0x4] ss:$0 sm:$0xff] }
 0x253   :  { %v257_v16 = vmax.f32 %v253_v13, %v256_v15  ;;  %v661_v13 = vld [vmem:[#allocation6 + $0x320] sm:$0xff] }
 0x255   :  { %1118 = vmatmul.mubr.f32.vlgmr.msra.gmra.mxu0 %v257_v16 }
 0x256   :  { %1187 = vmatprep.mubr.msk.f32.mxu0 %vm1401_vm0, %v1400_v0  ;;  %1156 = vmatpush3.msra.mxu0 %v474_v21  ;;  %v659_v21 = vld [vmem:[#allocation6 + $0x310] sm:$0xff] }
 0x257   :  { %1157 = vmatprep.subr.mxu0 %v1400_v0 }
 0x258   :  { %1158 = vmatpush3.msra.mxu0 %v473_v22  ;;  %v658_v22 = vld [vmem:[#allocation6 + $0x308] sm:$0xff] }
 0x259   :  { %1159 = vmatprep.subr.mxu0 %v1400_v0 }
 0x25a   :  { %1160 = vmatpush3.msra.mxu0 %v472_v23  ;;  %v657_v23 = vld [vmem:[#allocation6 + $0x300] sm:$0xff] }
 0x25b   :  { %1161 = vmatprep.subr.mxu0 %v1400_v0 }
 0x25c   :  { %1162 = vmatpush3.msra.mxu0 %v471_v24  ;;  %v771_v24 = vld [vmem:[#allocation6 + $0x3f8] sm:$0xff] }
 0x25d   :  { %1163 = vmatprep.subr.mxu0 %v1400_v0 }
 0x25e   :  { %1164 = vmatpush3.msra.mxu0 %v470_v25  ;;  %v770_v25 = vld [vmem:[#allocation6 + $0x3f0] sm:$0xff] }
 0x25f   :  { %1165 = vmatprep.subr.mxu0 %v1400_v0 }
 0x260   :  { %1166 = vmatpush3.msra.mxu0 %v469_v26  ;;  %v769_v26 = vld [vmem:[#allocation6 + $0x3e8] sm:$0xff] }
 0x261   :  { %1167 = vmatprep.subr.mxu0 %v1400_v0 }
 0x262   :  { %1168 = vmatpush3.msra.mxu0 %v468_v27  ;;  %v768_v27 = vld [vmem:[#allocation6 + $0x3e0] sm:$0xff] }
 0x263   :  { %1169 = vmatprep.subr.mxu0 %v1400_v0 }
 0x264   :  { %1170 = vmatpush3.msra.mxu0 %v467_v28  ;;  %v767_v28 = vld [vmem:[#allocation6 + $0x3d8] sm:$0xff] }
 0x265   :  { %1171 = vmatprep.subr.mxu0 %v1400_v0 }
 0x266   :  { %1172 = vmatpush3.msra.mxu0 %v466_v29  ;;  %v766_v29 = vld [vmem:[#allocation6 + $0x3d0] sm:$0xff] }
 0x267   :  { %1173 = vmatprep.subr.mxu0 %v1400_v0 }
 0x268   :  { %1174 = vmatpush3.msra.mxu0 %v465_v30  ;;  %v765_v30 = vld [vmem:[#allocation6 + $0x3c8] sm:$0xff] }
 0x269   :  { %1175 = vmatprep.subr.mxu0 %v1400_v0 }
 0x26a   :  { %1176 = vmatpush3.msra.mxu0 %v464_v31  ;;  %v764_v31 = vld [vmem:[#allocation6 + $0x3c0] sm:$0xff] }
 0x26b   :  { %1177 = vmatprep.subr.mxu0 %v1400_v0 }
 0x26c   :  { %1178 = vmatpush3.msra.mxu0 %v463_v32  ;;  %v763_v32 = vld [vmem:[#allocation6 + $0x3b8] sm:$0xff] }
 0x26d   :  { %1179 = vmatprep.subr.mxu0 %v1400_v0 }
 0x26e   :  { %1180 = vmatpush3.msra.mxu0 %v462_v39 }
 0x26f   :  { %1181 = vmatprep.subr.mxu0 %v1400_v0 }
 0x270   :  { %1182 = vmatpush3.msra.mxu0 %v461_v40 }
 0x271   :  { %1183 = vmatprep.subr.mxu0 %v1400_v0 }
 0x272   :  { %1184 = vmatpush3.msra.mxu0 %v460_v41 }
 0x273   :  { %1185 = vmatprep.subr.mxu0 %v1400_v0 }
 0x274   :  { %1186 = vmatpush3.msra.mxu0 %v459_v42  ;;  %v759_v42 = vld [vmem:[#allocation6 + $0x398] sm:$0xff] }
 0x275   :  { %1225 = vmatprep.subr.mxu0 %v1400_v0 }
 0x315   :  { %v351_v34 = vpop.f32.mrf.mxu0 }
 0x316   :  { %v352_v35 = vadd.f32 %v873_v33, %v351_v34  ;;  %v762_v33 = vld [vmem:[#allocation6 + $0x3b0] sm:$0xff]  ;;  %v761_v34 = vld [vmem:[#allocation6 + $0x3a8] sm:$0xff] }
 0x317   :  { %v1119_v36 = vpop.f32.mrf.mxu0 }
 0x318   :  { %v355_v37 = vmul.f32 0.2, %v352_v35  ;;  %v876_v36 = vld [vmem:[#allocation8 + $0x5] ss:$0 sm:$0xff] }
 0x31a   :  { %v356_v38 = vmax.f32 %v352_v35, %v355_v37  ;;  %v760_v35 = vld [vmem:[#allocation6 + $0x3a0] sm:$0xff] }
 0x31c   :  { %1153 = vmatmul.mubr.f32.vlgmr.msra.gmra.mxu1 %v356_v38 }
 0x31d   :  { %1222 = vmatprep.mubr.msk.f32.mxu1 %vm1401_vm0, %v1400_v0  ;;  %1191 = vmatpush3.msra.mxu1 %v573_v43  ;;  %v758_v43 = vld [vmem:[#allocation6 + $0x390] sm:$0xff] }
 0x31e   :  { %1192 = vmatprep.subr.mxu1 %v1400_v0 }
 0x31f   :  { %1193 = vmatpush3.msra.mxu1 %v572_v44  ;;  %v757_v44 = vld [vmem:[#allocation6 + $0x388] sm:$0xff] }
 0x320   :  { %1194 = vmatprep.subr.mxu1 %v1400_v0 }
 0x321   :  { %1195 = vmatpush3.msra.mxu1 %v571_v45  ;;  %v756_v45 = vld [vmem:[#allocation6 + $0x380] sm:$0xff] }
 0x322   :  { %1196 = vmatprep.subr.mxu1 %v1400_v0 }
 0x323   :  { %1197 = vmatpush3.msra.mxu1 %v570_v46  ;;  %v877_v46 = vld [vmem:[#allocation8 + $0x6] ss:$0 sm:$0xff] }
 0x324   :  { %1198 = vmatprep.subr.mxu1 %v1400_v0 }
 0x325   :  { %1199 = vmatpush3.msra.mxu1 %v569_v47 }
 0x326   :  { %1200 = vmatprep.subr.mxu1 %v1400_v0 }
 0x327   :  { %1201 = vmatpush3.msra.mxu1 %v568_v48 }
 0x328   :  { %1202 = vmatprep.subr.mxu1 %v1400_v0 }
 0x329   :  { %1203 = vmatpush3.msra.mxu1 %v567_v49 }
 0x32a   :  { %1204 = vmatprep.subr.mxu1 %v1400_v0 }
 0x32b   :  { %1205 = vmatpush3.msra.mxu1 %v566_v50 }
 0x32c   :  { %1206 = vmatprep.subr.mxu1 %v1400_v0 }
 0x32d   :  { %1207 = vmatpush3.msra.mxu1 %v565_v51 }
 0x32e   :  { %1208 = vmatprep.subr.mxu1 %v1400_v0 }
 0x32f   :  { %1209 = vmatpush3.msra.mxu1 %v564_v52  ;;  %v878_v52 = vld [vmem:[#allocation8 + $0x7] ss:$0 sm:$0xff] }
 0x330   :  { %1210 = vmatprep.subr.mxu1 %v1400_v0 }
 0x331   :  { %1211 = vmatpush3.msra.mxu1 %v563_v53 }
 0x332   :  { %1212 = vmatprep.subr.mxu1 %v1400_v0 }
 0x333   :  { %1213 = vmatpush3.msra.mxu1 %v562_v54 }
 0x334   :  { %1214 = vmatprep.subr.mxu1 %v1400_v0 }
 0x335   :  { %1215 = vmatpush3.msra.mxu1 %v561_v61 }
 0x336   :  { %1216 = vmatprep.subr.mxu1 %v1400_v0 }
 0x337   :  { %1217 = vmatpush3.msra.mxu1 %v560_v62 }
 0x338   :  { %1218 = vmatprep.subr.mxu1 %v1400_v0 }
 0x339   :  { %1219 = vmatpush3.msra.mxu1 %v559_v63 }
 0x33a   :  { %1220 = vmatprep.subr.mxu1 %v1400_v0 }
 0x33b   :  { %1221 = vmatpush3.msra.mxu1 %v558_v1 }
 0x33c   :  { %1260 = vmatprep.subr.mxu1 %v1400_v0 }
 0x3dc   :  { %v450_v56 = vpop.f32.mrf.mxu1 }
 0x3dd   :  { %v451_v57 = vadd.f32 %v874_v55, %v450_v56 }
 0x3de   :  { %v1154_v58 = vpop.f32.mrf.mxu1 }
 0x3df   :  { %v454_v59 = vmul.f32 0.2, %v451_v57 }
 0x3e1   :  { %v455_v60 = vmax.f32 %v451_v57, %v454_v59 }
 0x3e3   :  { %1188 = vmatmul.mubr.f32.vlgmr.msra.gmra.mxu0 %v455_v60 }
 0x3e4   :  { %1257 = vmatprep.mubr.msk.f32.mxu0 %vm1401_vm0, %v1400_v0  ;;  %1226 = vmatpush3.msra.mxu0 %v672_v2 }
 0x3e5   :  { %1227 = vmatprep.subr.mxu0 %v1400_v0 }
 0x3e6   :  { %1228 = vmatpush3.msra.mxu0 %v671_v3 }
 0x3e7   :  { %1229 = vmatprep.subr.mxu0 %v1400_v0 }
 0x3e8   :  { %1230 = vmatpush3.msra.mxu0 %v670_v4 }
 0x3e9   :  { %1231 = vmatprep.subr.mxu0 %v1400_v0 }
 0x3ea   :  { %1232 = vmatpush3.msra.mxu0 %v669_v5 }
 0x3eb   :  { %1233 = vmatprep.subr.mxu0 %v1400_v0 }
 0x3ec   :  { %1234 = vmatpush3.msra.mxu0 %v668_v6 }
 0x3ed   :  { %1235 = vmatprep.subr.mxu0 %v1400_v0 }
 0x3ee   :  { %1236 = vmatpush3.msra.mxu0 %v667_v7 }
 0x3ef   :  { %1237 = vmatprep.subr.mxu0 %v1400_v0 }
 0x3f0   :  { %1238 = vmatpush3.msra.mxu0 %v666_v8 }
 0x3f1   :  { %1239 = vmatprep.subr.mxu0 %v1400_v0 }
 0x3f2   :  { %1240 = vmatpush3.msra.mxu0 %v665_v9 }
 0x3f3   :  { %1241 = vmatprep.subr.mxu0 %v1400_v0 }
 0x3f4   :  { %1242 = vmatpush3.msra.mxu0 %v664_v10 }
 0x3f5   :  { %1243 = vmatprep.subr.mxu0 %v1400_v0 }
 0x3f6   :  { %1244 = vmatpush3.msra.mxu0 %v663_v11 }
 0x3f7   :  { %1245 = vmatprep.subr.mxu0 %v1400_v0 }
 0x3f8   :  { %1246 = vmatpush3.msra.mxu0 %v662_v12 }
 0x3f9   :  { %1247 = vmatprep.subr.mxu0 %v1400_v0 }
 0x3fa   :  { %1248 = vmatpush3.msra.mxu0 %v661_v13 }
 0x3fb   :  { %1249 = vmatprep.subr.mxu0 %v1400_v0 }
 0x3fc   :  { %1250 = vmatpush3.msra.mxu0 %v660_v20 }
 0x3fd   :  { %1251 = vmatprep.subr.mxu0 %v1400_v0 }
 0x3fe   :  { %1252 = vmatpush3.msra.mxu0 %v659_v21 }
 0x3ff   :  { %1253 = vmatprep.subr.mxu0 %v1400_v0 }
 0x400   :  { %1254 = vmatpush3.msra.mxu0 %v658_v22 }
 0x401   :  { %1255 = vmatprep.subr.mxu0 %v1400_v0 }
 0x402   :  { %1256 = vmatpush3.msra.mxu0 %v657_v23 }
 0x4a3   :  { %v549_v15 = vpop.f32.mrf.mxu0 }
 0x4a4   :  { %v550_v16 = vadd.f32 %v875_v14, %v549_v15 }
 0x4a5   :  { %v1189_v17 = vpop.f32.mrf.mxu0 }
 0x4a6   :  { %v553_v18 = vmul.f32 0.2, %v550_v16 }
 0x4a8   :  { %v554_v19 = vmax.f32 %v550_v16, %v553_v18 }
 0x4aa   :  { %1223 = vmatmul.mubr.f32.vlgmr.msra.gmra.mxu1 %v554_v19 }
 0x4ab   :  { %1292 = vmatprep.mubr.msk.f32.mxu1 %vm1401_vm0, %v1400_v0  ;;  %1261 = vmatpush3.msra.mxu1 %v771_v24 }
 0x4ac   :  { %1262 = vmatprep.subr.mxu1 %v1400_v0 }
 0x4ad   :  { %1263 = vmatpush3.msra.mxu1 %v770_v25 }
 0x4ae   :  { %1264 = vmatprep.subr.mxu1 %v1400_v0 }
 0x4af   :  { %1265 = vmatpush3.msra.mxu1 %v769_v26 }
 0x4b0   :  { %1266 = vmatprep.subr.mxu1 %v1400_v0 }
 0x4b1   :  { %1267 = vmatpush3.msra.mxu1 %v768_v27 }
 0x4b2   :  { %1268 = vmatprep.subr.mxu1 %v1400_v0 }
 0x4b3   :  { %1269 = vmatpush3.msra.mxu1 %v767_v28 }
 0x4b4   :  { %1270 = vmatprep.subr.mxu1 %v1400_v0 }
 0x4b5   :  { %1271 = vmatpush3.msra.mxu1 %v766_v29 }
 0x4b6   :  { %1272 = vmatprep.subr.mxu1 %v1400_v0 }
 0x4b7   :  { %1273 = vmatpush3.msra.mxu1 %v765_v30 }
 0x4b8   :  { %1274 = vmatprep.subr.mxu1 %v1400_v0 }
 0x4b9   :  { %1275 = vmatpush3.msra.mxu1 %v764_v31 }
 0x4ba   :  { %1276 = vmatprep.subr.mxu1 %v1400_v0 }
 0x4bb   :  { %1277 = vmatpush3.msra.mxu1 %v763_v32 }
 0x4bc   :  { %1278 = vmatprep.subr.mxu1 %v1400_v0 }
 0x4bd   :  { %1279 = vmatpush3.msra.mxu1 %v762_v33 }
 0x4be   :  { %1280 = vmatprep.subr.mxu1 %v1400_v0 }
 0x4bf   :  { %1281 = vmatpush3.msra.mxu1 %v761_v34 }
 0x4c0   :  { %1282 = vmatprep.subr.mxu1 %v1400_v0 }
 0x4c1   :  { %1283 = vmatpush3.msra.mxu1 %v760_v35 }
 0x4c2   :  { %1284 = vmatprep.subr.mxu1 %v1400_v0 }
 0x4c3   :  { %1285 = vmatpush3.msra.mxu1 %v759_v42 }
 0x4c4   :  { %1286 = vmatprep.subr.mxu1 %v1400_v0 }
 0x4c5   :  { %1287 = vmatpush3.msra.mxu1 %v758_v43 }
 0x4c6   :  { %1288 = vmatprep.subr.mxu1 %v1400_v0 }
 0x4c7   :  { %1289 = vmatpush3.msra.mxu1 %v757_v44 }
 0x4c8   :  { %1290 = vmatprep.subr.mxu1 %v1400_v0 }
 0x4c9   :  { %1291 = vmatpush3.msra.mxu1 %v756_v45 }
 0x56a   :  { %v648_v37 = vpop.f32.mrf.mxu1 }
 0x56b   :  { %v649_v38 = vadd.f32 %v876_v36, %v648_v37 }
 0x56c   :  { %v1224_v39 = vpop.f32.mrf.mxu1 }
 0x56d   :  { %v652_v40 = vmul.f32 0.2, %v649_v38 }
 0x56f   :  { %v653_v41 = vmax.f32 %v649_v38, %v652_v40 }
 0x571   :  { %1258 = vmatmul.mubr.f32.vlgmr.msra.gmra.mxu0 %v653_v41 }
 0x631   :  { %v747_v47 = vpop.f32.mrf.mxu0 }
 0x632   :  { %v748_v48 = vadd.f32 %v877_v46, %v747_v47 }
 0x633   :  { %v1259_v49 = vpop.f32.mrf.mxu0 }
 0x634   :  { %v751_v50 = vmul.f32 0.2, %v748_v48 }
 0x636   :  { %v752_v51 = vmax.f32 %v748_v48, %v751_v50 }
 0x638   :  { %1293 = vmatmul.mubr.f32.vlgmr.msra.gmra.mxu1 %v752_v51 }
 0x6f8   :  { %v846_v53 = vpop.f32.mrf.mxu1 }
 0x6f9   :  { %v847_v54 = vadd.f32 %v878_v52, %v846_v53 }
 0x6fa   :  { %v1294_v55 = vpop.f32.mrf.mxu1 }
 0x6fb   :  { %v850_v56 = vmul.f32 0.2, %v847_v54 }
 0x6fd   :  { %v851_v57 = vmax.f32 %v847_v54, %v850_v56 }
 0x6ff   :  { %854 = vst [vmem:[#allocation9] sm:$0xff] %v851_v57 }
 0x700   :  { %1378 = shalt.err (!%p1375_p5)
}
 0x701   :  { %864 = dma.vmem_to_hbm [thread:$0]  %s862_s2, 128, %s1587_s3, [#allocation5]  }
 0x702   :  { %1391 = dma.done.wait [#allocation5], 128  }
 0x703   :  { %1392 = vsyncadd [#allocation5], 4294967168 }
 0x704   :  { %868 = vsyncpa [#allocation4], 1 }
 0x705   :  { %869 = vsyncpa [#allocation7], 1 }
 0x706   :  { %870 = vsyncpa [#allocation5], 1 }

</bundles_post_ra>
